<compile_context>
chip_gen: v5e
topology: v5e:2x2
jax: 0.10.0
libtpu: 0.0.40
codegen_flags: <defaults>
</compile_context>

<pallas_src>
import jax
import jax.numpy as jnp
from jax import lax
from jax.experimental import pallas as pl
from jax.experimental.pallas import tpu as pltpu


def _final_layer_kernel(x_ref, mod_ref, w_ref, b_ref, o_ref):
    # x_ref:   (tn, H)   token tile of one batch element (x.dtype)
    # mod_ref: (2, H)    row 0 = shift, row 1 = (scale + 1), in x.dtype
    # w_ref:   (H, O)    linear weight (H x O, x.dtype)
    # b_ref:   (1, O)    linear bias (f32)
    # o_ref:   (tn, O)
    dtype = x_ref.dtype

    # LayerNorm (elementwise_affine=False, eps=1e-6) -- statistics in f32,
    # single pass: var = E[x^2] - E[x]^2.
    x32 = x_ref[...].astype(jnp.float32)
    mean = jnp.mean(x32, axis=-1, keepdims=True)
    mean_sq = jnp.mean(x32 * x32, axis=-1, keepdims=True)
    var = jnp.maximum(mean_sq - mean * mean, 0.0)
    xn = ((x32 - mean) * lax.rsqrt(var + 1e-6)).astype(dtype)

    # modulate: xn * (scale + 1) + shift   ('+1' already folded in the glue).
    shift = mod_ref[0:1, :]      # (1, H)
    scale1 = mod_ref[1:2, :]     # (1, H)
    xm = xn * scale1 + shift     # stays in x.dtype -> bf16 MXU path for bf16 x

    # Final linear projection on the MXU, f32 accumulation + f32 bias add.
    out = jnp.dot(xm, w_ref[...], preferred_element_type=jnp.float32)
    o_ref[...] = (out + b_ref[...]).astype(o_ref.dtype)


def _pick_token_tile(N, H, O, itemsize, target_rows=512,
                     vmem_budget_bytes=20 << 20):
    """Largest sublane-aligned divisor of N <= target that fits the budget."""
    pack = 16 if itemsize < 4 else 8
    per_row = (2 * H * itemsize      # x tile (double-buffered)
               + H * 4               # f32 LN temporary
               + 2 * O * itemsize    # out tile (double-buffered)
               + O * 4)              # f32 accumulator
    cap = int(min(target_rows, N,
                  max(pack, vmem_budget_bytes // max(per_row, 1))))
    best = None
    for d in range(cap, 0, -1):
        if N % d:
            continue
        if d % pack == 0 or d == N:
            return d
        if best is None:
            best = d
    return best if best is not None else N


def final_layer_forward(x, c, params, *, tn=None, target_rows=512,
                        vmem_budget_bytes=20 << 20):
    """x: (B, N, H), c: (B, H). Returns (B, N, num_patch*out_channels)."""
    B, N, H = x.shape
    w_ada, b_ada = params["w_ada"], params["b_ada"]
    w_lin = params["w_lin"].astype(x.dtype)        # keep MXU operand in x.dtype
    b_lin = params["b_lin"].astype(jnp.float32)    # bias added in f32
    O = w_lin.shape[1]

    # ---- glue: adaLN_modulation = Linear(SiLU(c)) -> shift, scale+1 ----
    silu_c = c * jax.nn.sigmoid(c)
    ada = jnp.dot(silu_c, w_ada) + b_ada           # (B, 2H)
    shift = ada[:, :H]
    scale1 = ada[:, H:] + 1                        # fold the '+1' here (XLA fuses)
    mod = jnp.stack([shift, scale1], axis=1).astype(x.dtype)   # (B, 2, H)

    if tn is None:
        tn = _pick_token_tile(N, H, O, x.dtype.itemsize,
                              target_rows, vmem_budget_bytes)
    assert N % tn == 0, (N, tn)

    # Rough VMEM footprint -> explicit scoped-VMEM limit with 2x headroom
    # (capped at 48 MiB so it is valid on v7x's 64 MiB physical VMEM).
    itb = x.dtype.itemsize
    est = (2 * tn * H * itb + tn * H * 4          # x + f32 LN temp
           + 2 * tn * O * itb + tn * O * 4        # out + f32 acc
           + 2 * H * O * itb                      # weight (double-buffered, tiny)
           + 2 * 2 * H * itb + 2 * O * 4)         # mod + bias
    vmem_limit = int(min(max(2 * est, 4 << 20), 48 << 20))

    grid = (B, N // tn)

    out = pl.pallas_call(
        _final_layer_kernel,
        out_shape=jax.ShapeDtypeStruct((B, N, O), x.dtype),
        grid_spec=pltpu.PrefetchScalarGridSpec(
            num_scalar_prefetch=0,
            grid=grid,
            in_specs=[
                pl.BlockSpec((None, tn, H), lambda b, i: (b, i, 0)),  # x
                pl.BlockSpec((None, 2, H), lambda b, i: (b, 0, 0)),   # shift/scale+1
                pl.BlockSpec((H, O), lambda b, i: (0, 0)),            # weight
                pl.BlockSpec((1, O), lambda b, i: (0, 0)),            # bias
            ],
            out_specs=pl.BlockSpec((None, tn, O), lambda b, i: (b, i, 0)),
        ),
        compiler_params=pltpu.CompilerParams(
            dimension_semantics=("parallel", "parallel"),
            vmem_limit_bytes=vmem_limit,
        ),
    )(x, mod, w_lin, b_lin.reshape(1, O))
    return out


def reference_forward(x, c, params):
    """Pure-JAX reference mirroring the PyTorch module semantics."""
    H = x.shape[-1]
    dtype = x.dtype
    silu_c = c * jax.nn.sigmoid(c)
    ada = jnp.dot(silu_c, params["w_ada"]) + params["b_ada"]
    shift, scale = ada[:, :H], ada[:, H:]

    xf = x.astype(jnp.float32)
    mean = jnp.mean(xf, axis=-1, keepdims=True)
    var = jnp.mean((xf - mean) ** 2, axis=-1, keepdims=True)
    xn = ((xf - mean) / jnp.sqrt(var + 1e-6)).astype(dtype)

    xm = xn * (scale[:, None, :].astype(dtype) + 1) + shift[:, None, :].astype(dtype)
    out = jnp.dot(xm.astype(dtype), params["w_lin"].astype(dtype),
                  preferred_element_type=jnp.float32)
    out = out + params["b_lin"].astype(jnp.float32)
    return out.astype(dtype)


def make_params(key, hidden_size, num_patch, out_channels, dtype=jnp.float32):
    k1, k2, k3, k4 = jax.random.split(key, 4)
    O = num_patch * out_channels
    lim = 1.0 / (hidden_size ** 0.5)
    return {
        "w_ada": jax.random.uniform(k1, (hidden_size, 2 * hidden_size),
                                    dtype, -lim, lim),
        "b_ada": jax.random.uniform(k2, (2 * hidden_size,), dtype, -lim, lim),
        "w_lin": jax.random.uniform(k3, (hidden_size, O), dtype, -lim, lim),
        "b_lin": jax.random.uniform(k4, (O,), dtype, -lim, lim),
    }


if __name__ == "__main__":
    B, N, H = 2, 8, 32
    num_patch, out_channels = 4, 4
    O = num_patch * out_channels

    key = jax.random.PRNGKey(0)
    kx, kc, kp = jax.random.split(key, 3)

    x = jax.random.normal(kx, (B, N, H), dtype=jnp.float32)
    c = jax.random.normal(kc, (B, H), dtype=jnp.float32)
    params = make_params(kp, H, num_patch, out_channels)

    # 1) f32, auto-chosen tile.
    out = jax.block_until_ready(final_layer_forward(x, c, params))
    ref = jax.block_until_ready(reference_forward(x, c, params))
    assert out.shape == (B, N, O), out.shape
    assert jnp.allclose(out, ref, atol=1e-4, rtol=1e-4), \
        f"max err {jnp.max(jnp.abs(out - ref))}"

    # 2) f32, multi-tile grid (tn < N) to exercise token tiling.
    N2 = 32
    x2 = jax.random.normal(kx, (B, N2, H), dtype=jnp.float32)
    out2 = jax.block_until_ready(final_layer_forward(x2, c, params, tn=8))
    ref2 = reference_forward(x2, c, params)
    assert jnp.allclose(out2, ref2, atol=1e-4, rtol=1e-4), \
        f"max err {jnp.max(jnp.abs(out2 - ref2))}"

    # 3) bf16 end-to-end (bf16 DMAs, bf16 MXU operands, f32 LN stats).
    xb = x.astype(jnp.bfloat16)
    cb = c.astype(jnp.bfloat16)
    pb = {k: v.astype(jnp.bfloat16) for k, v in params.items()}
    outb = jax.block_until_ready(final_layer_forward(xb, cb, pb))
    refb = reference_forward(xb, cb, pb)
    errb = jnp.max(jnp.abs(outb.astype(jnp.float32) - refb.astype(jnp.float32)))
    assert errb < 1e-1, f"bf16 max err {errb}"

    print("KERNEL_OK")
</pallas_src>

<mosaic_0001>
module attributes {stable_mosaic.version = 11 : i64} {
  func.func @_final_layer_kernel(%arg0: i32, %arg1: i32, %arg2: memref<1x8x32xf32, #tpu.memory_space<vmem>>, %arg3: memref<1x2x32xf32, #tpu.memory_space<vmem>>, %arg4: memref<32x16xf32, #tpu.memory_space<vmem>>, %arg5: memref<1x16xf32, #tpu.memory_space<vmem>>, %arg6: memref<1x8x16xf32, #tpu.memory_space<vmem>>) attributes {dimension_semantics = [#tpu.dimension_semantics<parallel>, #tpu.dimension_semantics<parallel>], iteration_bounds = array<i64: 2, 1>, scalar_prefetch = 0 : i64, scratch_operands = 0 : i64, tpu.core_type = #tpu.core_type<tc>, window_params = [{transform_indices = @transform_0, window_bounds = array<i64: 1, 8, 32>}, {transform_indices = @transform_1, window_bounds = array<i64: 1, 2, 32>}, {pipeline_mode = #tpu.pipeline_mode<synchronous>, transform_indices = @transform_2, window_bounds = array<i64: 32, 16>}, {pipeline_mode = #tpu.pipeline_mode<synchronous>, transform_indices = @transform_3, window_bounds = array<i64: 1, 16>}, {transform_indices = @transform_4, window_bounds = array<i64: 1, 8, 16>}]} {
    %c0 = arith.constant 0 : index
    %c0_0 = arith.constant 0 : index
    %c0_1 = arith.constant 0 : index
    %0 = vector.load %arg2[%c0, %c0_0, %c0_1] : memref<1x8x32xf32, #tpu.memory_space<vmem>>, vector<1x8x32xf32>
    %1 = vector.shape_cast %0 : vector<1x8x32xf32> to vector<8x32xf32>
    %cst = arith.constant dense<0.000000e+00> : vector<8xf32>
    %2 = vector.multi_reduction <add>, %1, %cst [1] : vector<8x32xf32> to vector<8xf32>
    %3 = vector.shape_cast %2 : vector<8xf32> to vector<8x1xf32>
    %cst_2 = arith.constant 3.200000e+01 : f32
    %4 = vector.broadcast %cst_2 : f32 to vector<8x1xf32>
    %5 = arith.divf %3, %4 : vector<8x1xf32>
    %6 = arith.mulf %1, %1 : vector<8x32xf32>
    %cst_3 = arith.constant dense<0.000000e+00> : vector<8xf32>
    %7 = vector.multi_reduction <add>, %6, %cst_3 [1] : vector<8x32xf32> to vector<8xf32>
    %8 = vector.shape_cast %7 : vector<8xf32> to vector<8x1xf32>
    %cst_4 = arith.constant 3.200000e+01 : f32
    %9 = vector.broadcast %cst_4 : f32 to vector<8x1xf32>
    %10 = arith.divf %8, %9 : vector<8x1xf32>
    %11 = arith.mulf %5, %5 : vector<8x1xf32>
    %12 = arith.subf %10, %11 : vector<8x1xf32>
    %cst_5 = arith.constant 0.000000e+00 : f32
    %13 = vector.broadcast %cst_5 : f32 to vector<8x1xf32>
    %14 = arith.maximumf %12, %13 : vector<8x1xf32>
    %15 = vector.broadcast %5 : vector<8x1xf32> to vector<8x32xf32>
    %16 = arith.subf %1, %15 : vector<8x32xf32>
    %cst_6 = arith.constant 9.99999997E-7 : f32
    %17 = vector.broadcast %cst_6 : f32 to vector<8x1xf32>
    %18 = arith.addf %14, %17 : vector<8x1xf32>
    %19 = math.rsqrt %18 : vector<8x1xf32>
    %20 = vector.broadcast %19 : vector<8x1xf32> to vector<8x32xf32>
    %21 = arith.mulf %16, %20 : vector<8x32xf32>
    %c0_7 = arith.constant 0 : index
    %c0_8 = arith.constant 0 : index
    %c0_9 = arith.constant 0 : index
    %22 = vector.load %arg3[%c0_7, %c0_8, %c0_9] : memref<1x2x32xf32, #tpu.memory_space<vmem>>, vector<1x1x32xf32>
    %23 = vector.shape_cast %22 : vector<1x1x32xf32> to vector<1x32xf32>
    %c0_10 = arith.constant 0 : index
    %c1 = arith.constant 1 : index
    %c0_11 = arith.constant 0 : index
    %24 = vector.load %arg3[%c0_10, %c1, %c0_11] : memref<1x2x32xf32, #tpu.memory_space<vmem>>, vector<1x1x32xf32>
    %25 = vector.shape_cast %24 : vector<1x1x32xf32> to vector<1x32xf32>
    %26 = vector.broadcast %25 : vector<1x32xf32> to vector<8x32xf32>
    %27 = arith.mulf %21, %26 : vector<8x32xf32>
    %28 = vector.broadcast %23 : vector<1x32xf32> to vector<8x32xf32>
    %29 = arith.addf %27, %28 : vector<8x32xf32>
    %c0_12 = arith.constant 0 : index
    %c0_13 = arith.constant 0 : index
    %30 = vector.load %arg4[%c0_12, %c0_13] : memref<32x16xf32, #tpu.memory_space<vmem>>, vector<32x16xf32>
    %cst_14 = arith.constant dense<0.000000e+00> : vector<8x16xf32>
    %31 = tpu.matmul %29, %30, %cst_14 {dimension_numbers = #tpu.dot_dimension_numbers<[1], [0], [0], [1], [0, 0, 1, 1], [], []>} : vector<8x32xf32>, vector<32x16xf32>, vector<8x16xf32> -> vector<8x16xf32>
    %c0_15 = arith.constant 0 : index
    %c0_16 = arith.constant 0 : index
    %32 = vector.load %arg5[%c0_15, %c0_16] : memref<1x16xf32, #tpu.memory_space<vmem>>, vector<1x16xf32>
    %33 = vector.broadcast %32 : vector<1x16xf32> to vector<8x16xf32>
    %34 = arith.addf %31, %33 : vector<8x16xf32>
    %c0_17 = arith.constant 0 : index
    %c0_18 = arith.constant 0 : index
    %c0_19 = arith.constant 0 : index
    %35 = vector.load %arg6[%c0_17, %c0_18, %c0_19] : memref<1x8x16xf32, #tpu.memory_space<vmem>>, vector<1x8x16xf32>
    %36 = vector.shape_cast %35 : vector<1x8x16xf32> to vector<8x16xf32>
    %37 = vector.shape_cast %34 : vector<8x16xf32> to vector<1x8x16xf32>
    tpu.vector_store %arg6[%c0_17, %c0_18, %c0_19], %37 {strides = array<i32>} : memref<1x8x16xf32, #tpu.memory_space<vmem>>, vector<1x8x16xf32>,
    return
  }
  func.func @transform_0(%arg0: i32, %arg1: i32) -> (i32, i32, i32) {
    %c0_i32 = arith.constant 0 : i32
    %c0_i32_0 = arith.constant 0 : i32
    return %arg0, %arg1, %c0_i32 : i32, i32, i32
  }
  func.func @transform_1(%arg0: i32, %arg1: i32) -> (i32, i32, i32) {
    %c0_i32 = arith.constant 0 : i32
    %c0_i32_0 = arith.constant 0 : i32
    %c0_i32_1 = arith.constant 0 : i32
    return %arg0, %c0_i32, %c0_i32_0 : i32, i32, i32
  }
  func.func @transform_2(%arg0: i32, %arg1: i32) -> (i32, i32) {
    %c0_i32 = arith.constant 0 : i32
    %c0_i32_0 = arith.constant 0 : i32
    %c0_i32_1 = arith.constant 0 : i32
    return %c0_i32, %c0_i32_0 : i32, i32
  }
  func.func @transform_3(%arg0: i32, %arg1: i32) -> (i32, i32) {
    %c0_i32 = arith.constant 0 : i32
    %c0_i32_0 = arith.constant 0 : i32
    %c0_i32_1 = arith.constant 0 : i32
    return %c0_i32, %c0_i32_0 : i32, i32
  }
  func.func @transform_4(%arg0: i32, %arg1: i32) -> (i32, i32, i32) {
    %c0_i32 = arith.constant 0 : i32
    %c0_i32_0 = arith.constant 0 : i32
    return %arg0, %arg1, %c0_i32 : i32, i32, i32
  }
}

</mosaic_0001>

<bundles_post_ra>
// kernel: tpu_custom_call.1
= control target key start
LH: loop header
LB: loop body
LE: loop exit
PB: predicated region body
PF: predicated region fallthrough
CT: control target
= control target key end

     0   :  { %9 = vsyncpa [#allocation3], 0  ;;  %s712_s0 = inlined_call_operand.vmem [shape: f32[2,8,32], index: 0, kind: input, shape index: {}]   ;;  %s713_s1 = inlined_call_operand.vmem [shape: f32[2,2,32], index: 1, kind: input, shape index: {}]   ;;  %s714_s2 = inlined_call_operand.vmem [shape: f32[32,16], index: 2, kind: input, shape index: {}]   ;;  %s715_s3 = inlined_call_operand.vmem [shape: f32[1,16], index: 3, kind: input, shape index: {}]   ;;  %s716_s4 = inlined_call_operand.hbm [shape: f32[2,8,16], index: 4, kind: output, shape index: {}]  }
   0x1   :  { %11 = vsyncpa [#allocation3 + $0x1], 0  ;;  %s590_s15 = smov 0   ;;  %s592_s16 = smov 0  }
   0x2   :  { %s594_s17 = smov 0   ;;  %s596_s18 = smov 0  }
   0x3   :  { %s598_s19 = smov 0   ;;  %s600_s20 = smov 0  }
   0x4 LB: > { %s408_s21 = sadd.s32 4294967295, %s562_s20   ;;  %s409_s22 = sadd.s32 4294967294, %s562_s20   ;;  %s562_s20 = sphi %s600_s20, %s17_s20   ;;  %s558_s19 = sphi %s598_s19, %s723_s19   ;;  %s554_s18 = sphi %s596_s18, %s722_s18   ;;  %s550_s17 = sphi %s594_s17, %s721_s17   ;;  %s546_s16 = sphi %s592_s16, %s720_s16   ;;  %s542_s15 = sphi %s590_s15, %s719_s15  }
   0x5   : > { %s29_s23 = sadd.s32 1, %s558_s19  ;;  %s134_s24 = sadd.s32 1, %s550_s17 }
   0x6   : > { %p31_p0 = scmp.ge.s32.totalorder %s29_s23, 2  ;;  %p144_p1 = scmp.ne.s32.totalorder %s550_s17, %s546_s16 }
   0x7   : > { %p145_p2 = scmp.eq.s32.totalorder %s408_s21, 1  ;;  %p150_p3 = scmp.ne.s32.totalorder %s546_s16, %s542_s15 }
   0x8   : > { %s725_s23 = smov (%p31_p0, %s29_s23), 0  ;;  %p151_p5 = scmp.eq.s32.totalorder %s409_s22, 1 }
   0x9   : > { %p630_p4 = por %p145_p2, %p144_p1  ;;  %s129_s26 = ssub.s32 %s558_s19, %s725_s23 }
   0xa   : > { %p412_p6 = scmp.ge.s32.totalorder %s562_s20, 1  ;;  %p132_p7 = scmp.eq.s32.totalorder %s129_s26, 0 }
   0xb   : > { %p637_p8 = por %p151_p5, %p150_p3  ;;  %p192_p9 = scmp.lt.s32.totalorder %s562_s20, 3 }
   0xc   : > { %s643_s28 = scalar_select %p132_p7, %s550_s17, %s134_s24  }
   0xd   : > { %p193_p10 = pnand %p412_p6, %p192_p9 }
   0xe   : > { %p224_p11 = scmp.lt.s32.totalorder (!%p193_p10), %s554_s18, 1  ;;  %s418_s6 = sshll.u32 (!%p193_p10), %s554_s18, 3 }
   0xf   : > { %196 = sbr.rel (%p193_p10) target bundleno = 313 (0x139), region = 36  ;;  %s320_s9 = scalar_lea.hbm (!%p193_p10), %s716_s4, %s418_s6 }
  0x10   : > { %s324_s21 = sshll.u32 (!%p193_p10), %s320_s9, 4  ;;  %s325_s21 = int_to_ptr.hbm [resolvable:$true] %s324_s21 }
  0x14   : > { %s225_s29 = scalar_select %p224_p11, %s554_s18, 1  ;;  %vm236_vm0 = vcmask 261120   ;;  %v564_v4 = vmov 32.0   ;;  %v278_v11 = vld [vmem:[%s714_s2 + $0x18] sm:$0xff]  ;;  %v277_v12 = vld [vmem:[%s714_s2 + $0x10] sm:$0xff]  ;;  %v276_v14 = vld [vmem:[%s714_s2 + $0x8] sm:$0xff] }
  0x15   : > { %480 = vrcp.f32 %v564_v4  ;;  %298 = vmatpush.msra.mxu0 %v278_v11  ;;  %v275_v15 = vld [vmem:[%s714_s2] sm:$0xff]  ;;  %vm306_vm5 = vcmask 130048   ;;  %s498_s18 = sshra.s32 %s325_s21, 4  ;;  %s499_s18 = int_to_ptr.hbm [resolvable:$true] %s498_s18 }
  0x16   : > { %s414_s30 = sshll.u32 %s225_s29, 3  ;;  %s415_s5 = sshll.u32 %s225_s29, 1  ;;  %v479_v36 = vld [vmem:[%s715_s3] ss:$0 sm:$0xff] }
  0x17   : > { %s230_s8 = scalar_lea.vmem %s712_s0, %s414_s30  ;;  %s653_s11 = scalar_lea.vmem %s713_s1, %s415_s5  ;;  %299 = vmatpush.msra.mxu0 %v277_v12 }
  0x18   : > { %v235_v0 = vld [vmem:[%s230_s8] sm:$0xff]  ;;  %s221_s30 = sand.u32 1, %s546_s16   ;;  %s500_s22 = scalar_lea.hbm %s499_s18, 8 }
  0x19   : > { %v237_v1 = vsel %vm236_vm0, %v235_v0, 0.0  ;;  %v248_v2 = vmul.f32 %v235_v0, %v235_v0  ;;  %300 = vmatpush.msra.mxu0 %v276_v14  ;;  %v477_v30 = vld [vmem:[%s653_s11 + $0x1] ss:$0 sm:$0xff]  ;;  %v478_v33 = vld [vmem:[%s653_s11] ss:$0 sm:$0xff]  ;;  %s413_s5 = sshll.u32 %s221_s30, 3  ;;  %p501_p12 = scmp.ne.s32.totalorder %s499_s18, %s500_s22 }
  0x1a   : > { %238 = vadd.xlane.f32.xlu0 %v237_v1  ;;  %s223_s13 = scalar_lea.vmem [#allocation2], %s413_s5  ;;  %s309_s11 = scalar_lea.sflag [#allocation3], %s221_s30 }
  0x1b   : > { %v249_v3 = vsel %vm236_vm0, %v248_v2, 0.0  ;;  %v481_v5 = vpop.eup %480  ;;  %301 = vmatpush.msra.mxu0 %v275_v15  ;;  %s322_s14 = sshll.u32 %s223_s13, 4  ;;  %p502_p13 = pnand %p501_p12, %p630_p4  ;;  %s323_s14 = int_to_ptr.vmem [resolvable:$true] %s322_s14 }
  0x1c   : > { %v241_v6 = vmul.f32 32.0, %v481_v5  ;;  %vm245_vm1 = vweird.f32 %v481_v5  ;;  %s504_s29 = scalar_lea.hbm %s716_s4, 16  ;;  %p505_p1 = scmp.lt.s32.totalorder %s499_s18, %s716_s4 }
  0x1d   : > { %p503_p0 = pneg %p502_p13  ;;  %p506_p2 = scmp.lt.s32.totalorder %s504_s29, %s500_s22 }
  0x1e   : > { %v242_v7 = vsub.f32 1.0, %v241_v6 }
  0x1f   : > { %p507_p3 = por %p506_p2, %p505_p1 }
  0x20   : > { %v243_v8 = vmul.f32 %v481_v5, %v242_v7 }
  0x21   : > { %p508_p5 = pnand %p507_p3, %p503_p0 }
  0x22   : > { %250 = vadd.xlane.f32.xlu0 %v249_v3  ;;  %v244_v9 = vadd.f32 %v481_v5, %v243_v8 }
  0x24   : > { %v246_v13 = vsel %vm245_vm1, %v481_v5, %v244_v9 }
  0x8d   : > { %v239_v10 = vpop.xlane.xlu0 %238 }
  0x8e   : > { %v247_v16 = vmul.f32 %v246_v13, %v239_v10 }
  0x90   : > { %v253_v18 = vmul.f32 %v247_v16, %v247_v16  ;;  %v256_v29 = vsub.f32 %v235_v0, %v247_v16 }
  0x95   : > { %v251_v17 = vpop.xlane.xlu0 %250 }
  0x96   : > { %v252_v19 = vmul.f32 %v251_v17, %v246_v13 }
  0x98   : > { %v254_v20 = vsub.f32 %v252_v19, %v253_v18 }
  0x9a   : > { %v255_v21 = vmax.f32 %v254_v20, 0.0 }
  0x9c   : > { %v257_v22 = vadd.f32 1e-06, %v255_v21 }
  0x9e   : > { %482 = vrsqrt.f32 %v257_v22  ;;  %vm264_vm3 = vweird.f32 %v257_v22 }
  0xa4   : > { %v483_v23 = vpop.eup %482 }
  0xa5   : > { %v259_v24 = vmul.f32 %v483_v23, %v257_v22  ;;  %vm265_vm2 = vweird.f32 %v483_v23 }
  0xa6   : > { %vm266_vm4 = vmor %vm264_vm3, %vm265_vm2 }
  0xa7   : > { %v260_v25 = vmul.f32 %v483_v23, %v259_v24 }
  0xa9   : > { %v261_v26 = vmul.f32 0.5, %v260_v25 }
  0xab   : > { %v262_v27 = vsub.f32 1.5, %v261_v26 }
  0xad   : > { %v263_v28 = vmul.f32 %v483_v23, %v262_v27 }
  0xaf   : > { %v267_v31 = vsel %vm266_vm4, %v483_v23, %v263_v28 }
  0xb0   : > { %v268_v32 = vmul.f32 %v267_v31, %v256_v29 }
  0xb2   : > { %v272_v34 = vmul.f32 %v477_v30, %v268_v32 }
  0xb4   : > { %v274_v35 = vadd.f32 %v478_v33, %v272_v34 }
  0xb6   : > { %416 = vmatmul.msk.f32.vlgmr.msra.gmra.mxu0 %vm236_vm0, %v274_v35 }
 0x133   : > { %v303_v37 = vpop.f32.mrf.mxu0 }
 0x134   : > { %v304_v38 = vadd.f32 %v479_v36, %v303_v37 }
 0x136   : > { %307 = vst.msk [vmem:[%s223_s13] sm:$0xff] %vm306_vm5, %v304_v38 }
 0x137   : > { %511 = shalt.err (!%p508_p5)
}
 0x138   : > { %421 = dma.vmem_to_hbm [thread:$0]  (%p630_p4), %s323_s14, 128, %s325_s21, %s309_s11  }
 0x139 PF: > { %p427_p6 = scmp.ge.s32.totalorder %s562_s20, 2  ;;  %s336_s30 = sand.u32 1, %s542_s15  }
 0x13a   : > { %s337_s7 = scalar_lea.sflag [#allocation3], %s336_s30 }
 0x13b   : > { %p424_p7 = pnand %p427_p6, %p637_p8 }
 0x13d   : > { %p425_p9 = pneg %p424_p7 }
 0x13f   : > { %537 = dma.done.wait (%p425_p9), %s337_s7, 128  }
 0x140   : > { %539 = vsyncadd (%p425_p9), %s337_s7, 4294967168  ;;  %s17_s20 = sadd.s32 1, %s562_s20   ;;  %s719_s15 = smov %s546_s16 }
 0x141   : > { %p14_p10 = scmp.ge.s32.totalorder %s17_s20, 4   ;;  %s720_s16 = smov %s550_s17 }
 0x142   : > { %s721_s17 = smov %s643_s28  ;;  %s722_s18 = smov %s558_s19 }
 0x143   : > { %s723_s19 = smov %s725_s23  ;;  %16 = sbr.rel (!%p14_p10) target bundleno = 4 (0x4), region = 74 }
 0x148   :  { %343 = vsyncpa [#allocation3], 1 }
 0x149   :  { %345 = vsyncpa [#allocation3 + $0x1], 1 }

</bundles_post_ra>
